<compile_context>
chip_gen: v7x
topology: tpu7x:2x2x1
jax: 0.10.0
libtpu: 0.0.40
codegen_flags: <defaults>
</compile_context>

<pallas_src>
import jax
import jax.numpy as jnp
from jax.experimental import pallas as pl
from jax.experimental.pallas import tpu as pltpu

_SUBLANE = 8
_SMALL_BATCH = 4096   # up to here: single grid-less call, whole problem in VMEM
_TB_DEFAULT = 4096    # batch tile for the large-B pipelined path


def _round_up(x, m):
    return (x + m - 1) // m * m


def _linear_kernel(x_ref, w_ref, b_ref, o_ref):
    # o = x @ W + b   (MXU matmul, f32 accumulation; bias add rides a free VPU slot)
    acc = jnp.dot(x_ref[...], w_ref[...], preferred_element_type=jnp.float32)
    o_ref[...] = (acc + b_ref[...]).astype(o_ref.dtype)


def simple_classifier_forward(x, w, b, *, tb=_TB_DEFAULT):
    """Forward of simple_classifier: x @ W + b.

    x: (B, n_latent) f32
    w: (n_latent, n_class) f32  (PyTorch stores (n_class, n_latent); pre-transposed)
    b: (n_class,) f32
    returns: (B, n_class) f32
    """
    B, n_latent = x.shape
    n_class = w.shape[1]
    b2 = b.reshape(1, n_class)

    if B <= _SMALL_BATCH:
        # Small/medium problem: grid-less pallas_call, whole arrays in VMEM.
        # No padding, no slicing -- output written at its natural width.
        return pl.pallas_call(
            _linear_kernel,
            out_shape=jax.ShapeDtypeStruct((B, n_class), x.dtype),
            in_specs=[
                pl.BlockSpec(memory_space=pltpu.MemorySpace.VMEM),
                pl.BlockSpec(memory_space=pltpu.MemorySpace.VMEM),
                pl.BlockSpec(memory_space=pltpu.MemorySpace.VMEM),
            ],
            out_specs=pl.BlockSpec(memory_space=pltpu.MemorySpace.VMEM),
        )(x, w, b2)

    # Large batch: tile ONLY the batch axis; W / b stay VMEM-resident
    # (constant index_maps), x/out tiles auto double-buffer so HBM DMA
    # overlaps the matmul. Keep >= 2 grid steps so both TensorCores get
    # work on v7x; the batch axis is "parallel" for dual-TC parts.
    tb = min(tb, _round_up(pl.cdiv(B, 2), _SUBLANE))
    grid = pl.cdiv(B, tb)   # ragged last block handled by Pallas boundary masking
    return pl.pallas_call(
        _linear_kernel,
        out_shape=jax.ShapeDtypeStruct((B, n_class), x.dtype),
        grid_spec=pltpu.PrefetchScalarGridSpec(
            num_scalar_prefetch=0,
            grid=(grid,),
            in_specs=[
                pl.BlockSpec((tb, n_latent), lambda i: (i, 0)),
                pl.BlockSpec((n_latent, n_class), lambda i: (0, 0)),
                pl.BlockSpec((1, n_class), lambda i: (0, 0)),
            ],
            out_specs=pl.BlockSpec((tb, n_class), lambda i: (i, 0)),
        ),
        compiler_params=pltpu.CompilerParams(
            dimension_semantics=("parallel",),
        ),
    )(x, w, b2)


if __name__ == "__main__":
    # Module hyperparameters (small, consistent with the forward semantics).
    n_latent, n_hidden, n_class = 32, 64, 10   # n_hidden unused by the module
    batch = 8

    key = jax.random.PRNGKey(0)
    k_x, k_w, k_b, k_x2 = jax.random.split(key, 4)

    # PyTorch Linear weight layout is (n_class, n_latent); pre-transpose for x @ W.
    w_torch_layout = jax.random.normal(k_w, (n_class, n_latent), dtype=jnp.float32) * 0.1
    b = jax.random.normal(k_b, (n_class,), dtype=jnp.float32) * 0.1
    w = w_torch_layout.T  # (n_latent, n_class)

    # --- Small-batch (grid-less) path ---
    x = jax.random.normal(k_x, (batch, n_latent), dtype=jnp.float32)
    out = jax.block_until_ready(simple_classifier_forward(x, w, b))
    ref = x @ w + b
    assert out.shape == (batch, n_class)
    assert jnp.allclose(out, ref, atol=1e-5, rtol=1e-5), "small-batch mismatch vs reference"

    # --- Batch-tiled (pipelined) path, with a ragged final block ---
    big_batch = 5000  # > _SMALL_BATCH, not a multiple of the tile -> exercises boundary masking
    x2 = jax.random.normal(k_x2, (big_batch, n_latent), dtype=jnp.float32)
    out2 = jax.block_until_ready(simple_classifier_forward(x2, w, b))
    ref2 = x2 @ w + b
    assert out2.shape == (big_batch, n_class)
    assert jnp.allclose(out2, ref2, atol=1e-5, rtol=1e-5), "tiled-batch mismatch vs reference"

    print("KERNEL_OK")
</pallas_src>

<mosaic_0001>
module attributes {stable_mosaic.version = 11 : i64} {
  func.func @_linear_kernel(%arg0: memref<8x32xf32, #tpu.memory_space<vmem>>, %arg1: memref<32x10xf32, #tpu.memory_space<vmem>>, %arg2: memref<1x10xf32, #tpu.memory_space<vmem>>, %arg3: memref<8x10xf32, #tpu.memory_space<vmem>>) attributes {dimension_semantics = [], scalar_prefetch = 0 : i64, scratch_operands = 0 : i64, tpu.core_type = #tpu.core_type<tc>} {
    %c0 = arith.constant 0 : index
    %c0_0 = arith.constant 0 : index
    %0 = vector.load %arg0[%c0, %c0_0] : memref<8x32xf32, #tpu.memory_space<vmem>>, vector<8x32xf32>
    %c0_1 = arith.constant 0 : index
    %c0_2 = arith.constant 0 : index
    %1 = vector.load %arg1[%c0_1, %c0_2] : memref<32x10xf32, #tpu.memory_space<vmem>>, vector<32x10xf32>
    %cst = arith.constant dense<0.000000e+00> : vector<8x10xf32>
    %2 = tpu.matmul %0, %1, %cst {dimension_numbers = #tpu.dot_dimension_numbers<[1], [0], [0], [1], [0, 0, 1, 1], [], []>} : vector<8x32xf32>, vector<32x10xf32>, vector<8x10xf32> -> vector<8x10xf32>
    %c0_3 = arith.constant 0 : index
    %c0_4 = arith.constant 0 : index
    %3 = vector.load %arg2[%c0_3, %c0_4] : memref<1x10xf32, #tpu.memory_space<vmem>>, vector<1x10xf32>
    %4 = vector.broadcast %3 : vector<1x10xf32> to vector<8x10xf32>
    %5 = arith.addf %2, %4 : vector<8x10xf32>
    %c0_5 = arith.constant 0 : index
    %c0_6 = arith.constant 0 : index
    %6 = vector.load %arg3[%c0_5, %c0_6] : memref<8x10xf32, #tpu.memory_space<vmem>>, vector<8x10xf32>
    tpu.vector_store %arg3[%c0_5, %c0_6], %5 {strides = array<i32>} : memref<8x10xf32, #tpu.memory_space<vmem>>, vector<8x10xf32>,
    return
  }
}

</mosaic_0001>

<bundles_post_ra>
// kernel: tpu_custom_call.1
= control target key start
LH: loop header
LB: loop body
LE: loop exit
PB: predicated region body
PF: predicated region fallthrough
CT: control target
= control target key end

     0   :  { %v169_v3 = vmov 0.0|0.0   ;;  %vm170_vm0 = vmmov 0   ;;  %v171_v6 = vmov 0.0   ;;  %s223_s0 = inlined_call_operand.vmem [shape: f32[8,32], index: 0, kind: input, shape index: {}]   ;;  %s224_s1 = inlined_call_operand.vmem [shape: f32[32,10], index: 1, kind: input, shape index: {}]   ;;  %s225_s2 = inlined_call_operand.vmem [shape: f32[1,10], index: 2, kind: input, shape index: {}]   ;;  %s226_s3 = inlined_call_operand.hbm [shape: f32[8,10], index: 3, kind: output, shape index: {}]  }
   0x1   :  { %v16_v0 = vld [vmem:[%s224_s1] sm:$0xff]  ;;  %v17_v1 = vld [vmem:[%s224_s1 + $0x8] sm:$0xff]  ;;  %v18_v2 = vld [vmem:[%s224_s1 + $0x10] sm:$0xff]  ;;  %135 = vmatprep.subr.bf16.mxu0 %v169_v3  ;;  %132 = vmatprep.mubr.msk.f32.mxu0 %vm170_vm0, %v171_v6 }
   0x2   :  { %v136_v4 = vpack.c.bf16 %v17_v1, %v16_v0  ;;  %v19_v5 = vld [vmem:[%s224_s1 + $0x18] sm:$0xff] }
   0x3   :  { %8 = vsyncpa [#allocation3], 0  ;;  %v139_v7 = vpack.c.bf16 %v19_v5, %v18_v2  ;;  %v15_v8 = vld [vmem:[%s223_s0] sm:$0xff]  ;;  %vm27_vm1 = vcmask 261120   ;;  %s172_s24 = smov [#allocation2]   ;;  %vm101_vm2 = vcmask 80896  }
   0x4   :  { %137 = vmatpush3.bf16.msra.mxu0 %v136_v4  ;;  %v117_v9 = vld [vmem:[%s225_s2] ss:$0 sm:$0xff]  ;;  %s109_s1 = sshll.u32 %s172_s24, 4  ;;  %s110_s1 = int_to_ptr.vmem [resolvable:$true] %s109_s1 }
   0x5   :  { %138 = vmatprep.subr.bf16.mxu0 %v169_v3  ;;  %s145_s25 = scalar_lea.vmem %s110_s1, 128  ;;  %p150_p1 = scmp.lt.s32.totalorder %s110_s1, %s110_s1 }
   0x6   :  { %p146_p0 = scmp.ne.s32.totalorder %s110_s1, %s145_s25  ;;  %p151_p2 = scmp.lt.s32.totalorder %s145_s25, %s145_s25 }
   0x8   :  { %140 = vmatpush3.bf16.msra.mxu0 %v139_v7  ;;  %p152_p3 = por %p151_p2, %p150_p1 }
   0xa   :  { %p153_p4 = pnand %p152_p3, %p146_p0 }
   0xb   :  { %133 = vmatmul.mubr.msk.f32.vlgmr.msra.gmra.mrb[0].mxu0 %vm27_vm1, %v15_v8 }
  0xde   :  { %v97_v10 = vpop.f32.mrb[0].mxu0 }
  0xdf   :  { %v98_v11 = vadd.f32 %v117_v9, %v97_v10  ;;  %v134_v12 = vpop.f32.mrb[1].mxu0 }
  0xe1   :  { %102 = vst.msk [vmem:[#allocation2] sm:$0xff] %vm101_vm2, %v98_v11 }
  0xe2   :  { %156 = shalt.err (!%p153_p4)
}
  0xe3   :  { %s157_s27 = scalar_lea.hbm %s226_s3, 128 }
  0xe4   :  { %p158_p5 = scmp.ne.s32.totalorder %s226_s3, %s157_s27  ;;  %p161_p6 = scmp.lt.u32.totalorder %s157_s27, %s226_s3 }
  0xe6   :  { %p163_p7 = pnand %p161_p6, %p158_p5 }
  0xe8   :  { %166 = shalt.err (!%p163_p7)
}
  0xe9   :  { %112 = dma.vmem_to_hbm [thread:$0]  %s110_s1, 128, %s226_s3, [#allocation3]  }
  0xea   :  { %167 = dma.done.wait [#allocation3], 128  }
  0xeb   :  { %168 = vsyncadd [#allocation3], 4294967168 }
  0xec   :  { %116 = vsyncpa [#allocation3], 1 }

</bundles_post_ra>
